<compile_context>
chip_gen: v6e
topology: v6e:2x2x1
jax: 0.10.0
libtpu: 0.0.40
codegen_flags: <defaults>
</compile_context>

<pallas_src>
import functools

import jax
import jax.numpy as jnp
from jax.experimental import pallas as pl
from jax.experimental.pallas import tpu as pltpu


def _fused_affine_kernel(x_ref, w_ref, b_ref, o_ref):
    # One fused affine map: o = x @ W_eff + b_eff, accumulated in f32 on the MXU.
    y = jnp.dot(x_ref[...], w_ref[...], preferred_element_type=jnp.float32)
    y = y + b_ref[...].astype(jnp.float32)
    o_ref[...] = y.astype(o_ref.dtype)


def multiclass_forward(x, params, *, batch_tile=512, compute_dtype=jnp.float32):
    """x: (B, F_in).  params: w1,b1,w2,b2,w3,b3 with weights (in,out), biases (1,out)."""
    w1, b1 = params["w1"], params["b1"]
    w2, b2 = params["w2"], params["b2"]
    w3, b3 = params["w3"], params["b3"]

    B, F_in = x.shape
    F_out = w3.shape[1]

    # ---- Algebraic fusion of the 3 activation-free linears (tiny, one-time). ----
    w_eff = ((w1 @ w2) @ w3).astype(compute_dtype)                 # (F_in, F_out)
    b_eff = (((b1 @ w2) + b2) @ w3 + b3).astype(jnp.float32)       # (1, F_out)

    # ---- Lane-dense output: pad the output width to a multiple of 128. ----
    n_pad = pl.cdiv(F_out, 128) * 128
    if n_pad != F_out:
        w_eff = jnp.pad(w_eff, ((0, 0), (0, n_pad - F_out)))
        b_eff = jnp.pad(b_eff, ((0, 0), (0, n_pad - F_out)))

    # ---- Batch tiling (auto-pipelined grid over batch). ----
    x_in = x.astype(compute_dtype)
    tb = min(batch_tile, B)
    if tb < B and tb % 8 != 0:          # keep sublane-aligned tiles when tiling
        tb = max(8, (tb // 8) * 8)
    b_pad = pl.cdiv(B, tb) * tb
    if b_pad != B:
        x_in = jnp.pad(x_in, ((0, b_pad - B), (0, 0)))
    grid = (b_pad // tb,)

    bytes_x = b_pad * F_in * x_in.dtype.itemsize
    bytes_w = w_eff.size * w_eff.dtype.itemsize + b_eff.size * b_eff.dtype.itemsize
    bytes_y = b_pad * n_pad * x.dtype.itemsize
    cost = pl.CostEstimate(
        flops=2 * b_pad * F_in * n_pad,
        transcendentals=0,
        bytes_accessed=bytes_x + bytes_w + bytes_y,
    )

    y_pad = pl.pallas_call(
        _fused_affine_kernel,
        out_shape=jax.ShapeDtypeStruct((b_pad, n_pad), x.dtype),
        grid=grid,
        in_specs=[
            pl.BlockSpec((tb, F_in), lambda i: (i, 0)),      # batch-tiled x
            pl.BlockSpec((F_in, n_pad), lambda i: (0, 0)),   # W_eff, VMEM-resident
            pl.BlockSpec((1, n_pad), lambda i: (0, 0)),      # b_eff, VMEM-resident
        ],
        out_specs=pl.BlockSpec((tb, n_pad), lambda i: (i, 0)),
        compiler_params=pltpu.CompilerParams(
            dimension_semantics=("parallel",),
        ),
        cost_estimate=cost,
    )(x_in, w_eff, b_eff)

    return y_pad[:B, :F_out]


def init_params(key, input_features, output_features, hidden_units=8):
    """Deterministic init mimicking nn.Linear (uniform +/- 1/sqrt(fan_in))."""
    ks = jax.random.split(key, 6)

    def linear(kw, kb, fan_in, fan_out):
        bound = 1.0 / jnp.sqrt(jnp.float32(fan_in))
        w = jax.random.uniform(kw, (fan_in, fan_out), jnp.float32, -bound, bound)
        b = jax.random.uniform(kb, (1, fan_out), jnp.float32, -bound, bound)
        return w, b

    w1, b1 = linear(ks[0], ks[1], input_features, hidden_units)
    w2, b2 = linear(ks[2], ks[3], hidden_units, hidden_units)
    w3, b3 = linear(ks[4], ks[5], hidden_units, output_features)
    return {"w1": w1, "b1": b1, "w2": w2, "b2": b2, "w3": w3, "b3": b3}


if __name__ == "__main__":
    key = jax.random.PRNGKey(0)
    k_x, k_p = jax.random.split(key)

    batch = 8
    input_features = 32
    hidden_units = 8
    output_features = 4

    x = jax.random.normal(k_x, (batch, input_features), jnp.float32)
    params = init_params(k_p, input_features, output_features, hidden_units)

    fwd = jax.jit(functools.partial(multiclass_forward))
    y = jax.block_until_ready(fwd(x, params))

    # Reference: the un-fused 3-layer forward (same math as the PyTorch module).
    ref = x @ params["w1"] + params["b1"]
    ref = ref @ params["w2"] + params["b2"]
    ref = ref @ params["w3"] + params["b3"]

    assert y.shape == (batch, output_features)
    assert jnp.allclose(y, ref, atol=2e-5, rtol=1e-4), float(jnp.abs(y - ref).max())

    print("KERNEL_OK")
</pallas_src>

<mosaic_0001>
module attributes {stable_mosaic.version = 11 : i64} {
  func.func @_fused_affine_kernel(%arg0: i32, %arg1: memref<8x32xf32, #tpu.memory_space<vmem>>, %arg2: memref<32x128xf32, #tpu.memory_space<vmem>>, %arg3: memref<1x128xf32, #tpu.memory_space<vmem>>, %arg4: memref<8x128xf32, #tpu.memory_space<vmem>>) attributes {dimension_semantics = [#tpu.dimension_semantics<parallel>], iteration_bounds = array<i64: 1>, scalar_prefetch = 0 : i64, scratch_operands = 0 : i64, tpu.core_type = #tpu.core_type<tc>, window_params = [{transform_indices = @transform_0, window_bounds = array<i64: 8, 32>}, {pipeline_mode = #tpu.pipeline_mode<synchronous>, transform_indices = @transform_1, window_bounds = array<i64: 32, 128>}, {pipeline_mode = #tpu.pipeline_mode<synchronous>, transform_indices = @transform_2, window_bounds = array<i64: 1, 128>}, {transform_indices = @transform_3, window_bounds = array<i64: 8, 128>}]} {
    %c0 = arith.constant 0 : index
    %c0_0 = arith.constant 0 : index
    %0 = vector.load %arg1[%c0, %c0_0] : memref<8x32xf32, #tpu.memory_space<vmem>>, vector<8x32xf32>
    %c0_1 = arith.constant 0 : index
    %c0_2 = arith.constant 0 : index
    %1 = vector.load %arg2[%c0_1, %c0_2] : memref<32x128xf32, #tpu.memory_space<vmem>>, vector<32x128xf32>
    %cst = arith.constant dense<0.000000e+00> : vector<8x128xf32>
    %2 = tpu.matmul %0, %1, %cst {dimension_numbers = #tpu.dot_dimension_numbers<[1], [0], [0], [1], [0, 0, 1, 1], [], []>} : vector<8x32xf32>, vector<32x128xf32>, vector<8x128xf32> -> vector<8x128xf32>
    %c0_3 = arith.constant 0 : index
    %c0_4 = arith.constant 0 : index
    %3 = vector.load %arg3[%c0_3, %c0_4] : memref<1x128xf32, #tpu.memory_space<vmem>>, vector<1x128xf32>
    %4 = vector.broadcast %3 : vector<1x128xf32> to vector<8x128xf32>
    %5 = arith.addf %2, %4 : vector<8x128xf32>
    %c0_5 = arith.constant 0 : index
    %c0_6 = arith.constant 0 : index
    %6 = vector.load %arg4[%c0_5, %c0_6] : memref<8x128xf32, #tpu.memory_space<vmem>>, vector<8x128xf32>
    tpu.vector_store %arg4[%c0_5, %c0_6], %5 {strides = array<i32>} : memref<8x128xf32, #tpu.memory_space<vmem>>, vector<8x128xf32>,
    return
  }
  func.func @transform_0(%arg0: i32) -> (i32, i32) {
    %c0_i32 = arith.constant 0 : i32
    %c0_i32_0 = arith.constant 0 : i32
    return %arg0, %c0_i32 : i32, i32
  }
  func.func @transform_1(%arg0: i32) -> (i32, i32) {
    %c0_i32 = arith.constant 0 : i32
    %c0_i32_0 = arith.constant 0 : i32
    %c0_i32_1 = arith.constant 0 : i32
    return %c0_i32, %c0_i32_0 : i32, i32
  }
  func.func @transform_2(%arg0: i32) -> (i32, i32) {
    %c0_i32 = arith.constant 0 : i32
    %c0_i32_0 = arith.constant 0 : i32
    %c0_i32_1 = arith.constant 0 : i32
    return %c0_i32, %c0_i32_0 : i32, i32
  }
  func.func @transform_3(%arg0: i32) -> (i32, i32) {
    %c0_i32 = arith.constant 0 : i32
    %c0_i32_0 = arith.constant 0 : i32
    return %arg0, %c0_i32 : i32, i32
  }
}

</mosaic_0001>

<bundles_post_ra>
// kernel: multiclass_forward.1
= control target key start
LH: loop header
LB: loop body
LE: loop exit
PB: predicated region body
PF: predicated region fallthrough
CT: control target
= control target key end

     0   :  { %v125_v0 = vmov 0.0   ;;  %vm126_vm0 = vmmov 0   ;;  %vm26_vm1 = vcmask 261120   ;;  %s168_s1 = inlined_call_operand.vmem [shape: f32[32,128], index: 1, kind: input, shape index: {}]   ;;  %s169_s0 = inlined_call_operand.vmem [shape: f32[8,32], index: 0, kind: input, shape index: {}]   ;;  %s170_s2 = inlined_call_operand.vmem [shape: f32[1,128], index: 2, kind: input, shape index: {}]   ;;  %s171_s3 = inlined_call_operand.vmem [shape: f32[8,128], index: 3, kind: output, shape index: {}]  }
   0x1   :  { %112 = vmatprep.subr.mxu0 %v125_v0  ;;  %v18_v1 = vld [vmem:[%s168_s1 + $0x18] sm:$0xff]  ;;  %v17_v2 = vld [vmem:[%s168_s1 + $0x10] sm:$0xff]  ;;  %120 = vmatprep.mubr.msk.f32.mxu0 %vm126_vm0, %v125_v0  ;;  %v16_v3 = vld [vmem:[%s168_s1 + $0x8] sm:$0xff] }
   0x2   :  { %113 = vmatpush3.msra.mxu0 %v18_v1  ;;  %v15_v4 = vld [vmem:[%s168_s1] sm:$0xff] }
   0x3   :  { %114 = vmatprep.subr.mxu0 %v125_v0  ;;  %v14_v5 = vld [vmem:[%s169_s0] sm:$0xff] }
   0x4   :  { %115 = vmatpush3.msra.mxu0 %v17_v2  ;;  %v105_v6 = vld [vmem:[%s170_s2] ss:$0 sm:$0xff] }
   0x5   :  { %116 = vmatprep.subr.mxu0 %v125_v0 }
   0x6   :  { %117 = vmatpush3.msra.mxu0 %v16_v3 }
   0x7   :  { %118 = vmatprep.subr.mxu0 %v125_v0 }
   0x8   :  { %119 = vmatpush3.msra.mxu0 %v15_v4 }
   0x9   :  { %121 = vmatmul.mubr.msk.f32.vlgmr.msra.gmra.mxu0 %vm26_vm1, %v14_v5 }
  0xc9   :  { %v96_v7 = vpop.f32.mrf.mxu0 }
  0xca   :  { %v97_v8 = vadd.f32 %v105_v6, %v96_v7 }
  0xcb   :  { %v122_v9 = vpop.f32.mrf.mxu0 }
  0xcc   :  { %100 = vst [vmem:[%s171_s3] sm:$0xff] %v97_v8 }

</bundles_post_ra>
